<compile_context>
chip_gen: v7x
topology: tpu7x:2x2x1
jax: 0.10.0
libtpu: 0.0.40
codegen_flags: <defaults>
</compile_context>

<pallas_src>
import functools

import jax
import jax.numpy as jnp
from jax import lax
from jax.experimental import pallas as pl
from jax.experimental.pallas import tpu as pltpu

_NEG_BIG = -1e30  # pad-column logit bias; exp(_NEG_BIG - max) underflows to 0.


def _round_up(n, m):
    return ((n + m - 1) // m) * m


# ---------------------------------------------------------------------------
# Kernel
# ---------------------------------------------------------------------------
def _mlp_kernel(x_ref, w1_ref, b1_ref, w2_ref, b2_ref, w3_ref, b3_ref, o_ref):
    """One batch tile: 3 matmuls (MXU, f32 accumulate) + stable softmax."""
    wdt = w1_ref.dtype  # weight storage dtype (bf16 default, f32 optional)
    prec = (lax.Precision.HIGHEST if wdt == jnp.float32
            else lax.Precision.DEFAULT)

    # L1
    h = jnp.dot(x_ref[...].astype(wdt), w1_ref[...],
                preferred_element_type=jnp.float32, precision=prec)
    h = h + b1_ref[...]                      # biases are f32
    # L2
    h = jnp.dot(h.astype(wdt), w2_ref[...],
                preferred_element_type=jnp.float32, precision=prec)
    h = h + b2_ref[...]
    # L3 (tag dim padded to a lane-dense multiple of 128; pad cols masked via bias)
    logits = jnp.dot(h.astype(wdt), w3_ref[...],
                     preferred_element_type=jnp.float32, precision=prec)
    logits = logits + b3_ref[...]

    # Numerically stable softmax over the tag axis (PyTorch dim=1 on 2-D input).
    # Exact divide (approx reciprocal is too coarse for a tight f32 check).
    m = jnp.max(logits, axis=-1, keepdims=True)
    e = jnp.exp(logits - m)
    denom = jnp.sum(e, axis=-1, keepdims=True)
    o_ref[...] = (e / denom).astype(o_ref.dtype)


# ---------------------------------------------------------------------------
# VMEM budgeting / tiling
# ---------------------------------------------------------------------------
def _vmem_budget():
    """(tile-selection target, vmem_limit cap) in bytes, generation-aware."""
    cap = 64 << 20  # conservative default (v7x per-TC physical VMEM)
    try:
        cap = int(pltpu.get_tpu_info().vmem_capacity_bytes)
    except Exception:
        pass
    if cap >= (96 << 20):            # v5e / v6e: 128 MiB physical VMEM
        return 72 << 20, 100 << 20
    return 24 << 20, 48 << 20         # v7x: 64 MiB physical VMEM


def _vmem_estimate(tm, d, t_pad, w_bytes):
    """Rough VMEM footprint (bytes) for one grid step."""
    weights = (2 * d * d + d * t_pad) * w_bytes + (2 * d + t_pad) * 4  # single-buffered
    acts = (tm * d + tm * t_pad) * 4          # x tile + out tile (f32), double-buffered
    inter = 2 * tm * d * 4                    # h1 / h2 intermediates (f32)
    return weights + 2 * acts + inter


def _pick_tm(b, d, t_pad, w_bytes, vmem_target):
    """Largest batch tile (multiple of 8) within the VMEM budget; no divisor
    constraint on B — the wrapper pads the batch up to a multiple of TM."""
    b8 = _round_up(max(b, 1), 8)
    for tm in (2048, 1024, 512, 256, 128, 64, 32, 16, 8):
        if _vmem_estimate(tm, d, t_pad, w_bytes) <= vmem_target:
            return min(tm, b8)
    return min(8, b8)


# ---------------------------------------------------------------------------
# Wrapper
# ---------------------------------------------------------------------------
@functools.partial(jax.jit, static_argnames=("tag_size",))
def mlp_forward(x, params, *, tag_size):
    """x: [B, encoder_dim] f32.  params: output of prepare_params()."""
    B, D = x.shape
    w1, b1 = params["w1"], params["b1"]
    w2, b2 = params["w2"], params["b2"]
    w3, b3 = params["w3"], params["b3"]
    T_pad = w3.shape[1]

    w_bytes = jnp.dtype(w1.dtype).itemsize
    vmem_target, vmem_cap = _vmem_budget()
    TM = _pick_tm(B, D, T_pad, w_bytes, vmem_target)

    B_pad = _round_up(B, TM)
    if B_pad != B:
        x = jnp.pad(x, ((0, B_pad - B), (0, 0)))
    grid = (B_pad // TM,)

    est = _vmem_estimate(TM, D, T_pad, w_bytes)
    vmem_limit = int(min(max(2 * est, 8 << 20), vmem_cap))

    # Weights/biases: constant block index -> resident in VMEM, single-buffered.
    resident = lambda shape: pl.BlockSpec(shape, lambda i: (0, 0),
                                          pipeline_mode=pl.Buffered(1))

    out = pl.pallas_call(
        _mlp_kernel,
        out_shape=jax.ShapeDtypeStruct((B_pad, T_pad), jnp.float32),
        grid=grid,
        in_specs=[
            pl.BlockSpec((TM, D), lambda i: (i, 0)),       # x tile (double-buffered)
            resident((D, D)), resident((1, D)),            # w1, b1
            resident((D, D)), resident((1, D)),            # w2, b2
            resident((D, T_pad)), resident((1, T_pad)),    # w3, b3 (padded cols)
        ],
        out_specs=pl.BlockSpec((TM, T_pad), lambda i: (i, 0)),
        compiler_params=pltpu.CompilerParams(
            dimension_semantics=("parallel",),             # megacore on v7x
            vmem_limit_bytes=vmem_limit,
        ),
    )(x, w1, b1, w2, b2, w3, b3)

    return out[:B, :tag_size]


# ---------------------------------------------------------------------------
# Parameter handling
# ---------------------------------------------------------------------------
def init_params(key, encoder_dim, tag_size):
    """PyTorch-convention (out, in) weights, Kaiming-uniform-ish init."""
    ks = jax.random.split(key, 6)

    def lin(kw, kb, fan_in, fan_out):
        bound = 1.0 / jnp.sqrt(fan_in)
        w = jax.random.uniform(kw, (fan_out, fan_in), jnp.float32, -bound, bound)
        b = jax.random.uniform(kb, (fan_out,), jnp.float32, -bound, bound)
        return w, b

    w1, b1 = lin(ks[0], ks[1], encoder_dim, encoder_dim)
    w2, b2 = lin(ks[2], ks[3], encoder_dim, encoder_dim)
    w3, b3 = lin(ks[4], ks[5], encoder_dim, tag_size)
    return {"w1": w1, "b1": b1, "w2": w2, "b2": b2, "w3": w3, "b3": b3}


def prepare_params(torch_params, weight_dtype=jnp.bfloat16):
    """One-time layout prep: transpose (out,in)->(in,out), reshape biases,
    cast weights to bf16 by default (MXU fast path on v5e/v6e/v7x), and pad the
    tag dimension of w3/b3 up to a multiple of 128 (lane-dense output).
    Biases stay f32 so bias-add / softmax stay f32 (no bf16 VPU on v5e)."""
    D = torch_params["w1"].shape[0]
    T = torch_params["w3"].shape[0]
    T_pad = _round_up(max(T, 1), 128)

    w3 = torch_params["w3"].T.astype(weight_dtype)                      # (D, T)
    w3 = jnp.pad(w3, ((0, 0), (0, T_pad - T)))                          # zero cols
    b3 = torch_params["b3"].reshape(1, T).astype(jnp.float32)
    b3 = jnp.pad(b3, ((0, 0), (0, T_pad - T)), constant_values=_NEG_BIG)

    return {
        "w1": torch_params["w1"].T.astype(weight_dtype),
        "b1": torch_params["b1"].reshape(1, D).astype(jnp.float32),
        "w2": torch_params["w2"].T.astype(weight_dtype),
        "b2": torch_params["b2"].reshape(1, D).astype(jnp.float32),
        "w3": w3,
        "b3": b3,
    }


def mlp_reference(x, torch_params):
    p = "highest"
    h = jnp.dot(x, torch_params["w1"].T, precision=p) + torch_params["b1"]
    h = jnp.dot(h, torch_params["w2"].T, precision=p) + torch_params["b2"]
    logits = jnp.dot(h, torch_params["w3"].T, precision=p) + torch_params["b3"]
    return jax.nn.softmax(logits, axis=1)


# ---------------------------------------------------------------------------
# Demo / self-test
# ---------------------------------------------------------------------------
if __name__ == "__main__":
    key = jax.random.PRNGKey(0)
    k_x, k_p = jax.random.split(key)

    batch, encoder_dim, tag_size = 8, 32, 16
    x = jax.random.normal(k_x, (batch, encoder_dim), jnp.float32)
    torch_params = init_params(k_p, encoder_dim, tag_size)
    ref = mlp_reference(x, torch_params)

    # f32-weight path: strict check against the pure-JAX reference.
    params_f32 = prepare_params(torch_params, jnp.float32)
    out = jax.block_until_ready(mlp_forward(x, params_f32, tag_size=tag_size))
    assert out.shape == (batch, tag_size)
    assert jnp.allclose(out, ref, atol=1e-4, rtol=1e-4), "f32 mismatch vs reference"
    assert jnp.allclose(jnp.sum(out, axis=1), 1.0, atol=1e-4), "rows must sum to 1"

    # bf16-weight default path (MXU-native on all generations): loose check.
    params_bf16 = prepare_params(torch_params)  # bf16 weights by default
    out_bf16 = jax.block_until_ready(mlp_forward(x, params_bf16, tag_size=tag_size))
    assert out_bf16.shape == (batch, tag_size)
    assert bool(jnp.all(jnp.isfinite(out_bf16)))
    assert jnp.allclose(out_bf16, ref, atol=5e-2, rtol=5e-2), "bf16 path diverged"
    assert jnp.allclose(jnp.sum(out_bf16, axis=1), 1.0, atol=1e-2)

    print("KERNEL_OK")
</pallas_src>

<mosaic_0001>
module attributes {stable_mosaic.version = 11 : i64} {
  func.func @_mlp_kernel(%arg0: i32, %arg1: memref<8x32xf32, #tpu.memory_space<vmem>>, %arg2: memref<32x32xf32, #tpu.memory_space<vmem>>, %arg3: memref<1x32xf32, #tpu.memory_space<vmem>>, %arg4: memref<32x32xf32, #tpu.memory_space<vmem>>, %arg5: memref<1x32xf32, #tpu.memory_space<vmem>>, %arg6: memref<32x128xf32, #tpu.memory_space<vmem>>, %arg7: memref<1x128xf32, #tpu.memory_space<vmem>>, %arg8: memref<8x128xf32, #tpu.memory_space<vmem>>) attributes {dimension_semantics = [#tpu.dimension_semantics<parallel>], iteration_bounds = array<i64: 1>, scalar_prefetch = 0 : i64, scratch_operands = 0 : i64, tpu.core_type = #tpu.core_type<tc>, window_params = [{transform_indices = @transform_0, window_bounds = array<i64: 8, 32>}, {pipeline_mode = #tpu.pipeline_mode<synchronous>, transform_indices = @transform_1, window_bounds = array<i64: 32, 32>}, {pipeline_mode = #tpu.pipeline_mode<synchronous>, transform_indices = @transform_2, window_bounds = array<i64: 1, 32>}, {pipeline_mode = #tpu.pipeline_mode<synchronous>, transform_indices = @transform_3, window_bounds = array<i64: 32, 32>}, {pipeline_mode = #tpu.pipeline_mode<synchronous>, transform_indices = @transform_4, window_bounds = array<i64: 1, 32>}, {pipeline_mode = #tpu.pipeline_mode<synchronous>, transform_indices = @transform_5, window_bounds = array<i64: 32, 128>}, {pipeline_mode = #tpu.pipeline_mode<synchronous>, transform_indices = @transform_6, window_bounds = array<i64: 1, 128>}, {transform_indices = @transform_7, window_bounds = array<i64: 8, 128>}]} {
    %c0 = arith.constant 0 : index
    %c0_0 = arith.constant 0 : index
    %0 = vector.load %arg1[%c0, %c0_0] : memref<8x32xf32, #tpu.memory_space<vmem>>, vector<8x32xf32>
    %c0_1 = arith.constant 0 : index
    %c0_2 = arith.constant 0 : index
    %1 = vector.load %arg2[%c0_1, %c0_2] : memref<32x32xf32, #tpu.memory_space<vmem>>, vector<32x32xf32>
    %cst = arith.constant dense<0.000000e+00> : vector<8x32xf32>
    %2 = tpu.matmul %0, %1, %cst {dimension_numbers = #tpu.dot_dimension_numbers<[1], [0], [0], [1], [0, 0, 1, 1], [], []>, precision = #tpu.contract_precision<fp32>} : vector<8x32xf32>, vector<32x32xf32>, vector<8x32xf32> -> vector<8x32xf32>
    %c0_3 = arith.constant 0 : index
    %c0_4 = arith.constant 0 : index
    %3 = vector.load %arg3[%c0_3, %c0_4] : memref<1x32xf32, #tpu.memory_space<vmem>>, vector<1x32xf32>
    %4 = vector.broadcast %3 : vector<1x32xf32> to vector<8x32xf32>
    %5 = arith.addf %2, %4 : vector<8x32xf32>
    %c0_5 = arith.constant 0 : index
    %c0_6 = arith.constant 0 : index
    %6 = vector.load %arg4[%c0_5, %c0_6] : memref<32x32xf32, #tpu.memory_space<vmem>>, vector<32x32xf32>
    %cst_7 = arith.constant dense<0.000000e+00> : vector<8x32xf32>
    %7 = tpu.matmul %5, %6, %cst_7 {dimension_numbers = #tpu.dot_dimension_numbers<[1], [0], [0], [1], [0, 0, 1, 1], [], []>, precision = #tpu.contract_precision<fp32>} : vector<8x32xf32>, vector<32x32xf32>, vector<8x32xf32> -> vector<8x32xf32>
    %c0_8 = arith.constant 0 : index
    %c0_9 = arith.constant 0 : index
    %8 = vector.load %arg5[%c0_8, %c0_9] : memref<1x32xf32, #tpu.memory_space<vmem>>, vector<1x32xf32>
    %9 = vector.broadcast %8 : vector<1x32xf32> to vector<8x32xf32>
    %10 = arith.addf %7, %9 : vector<8x32xf32>
    %c0_10 = arith.constant 0 : index
    %c0_11 = arith.constant 0 : index
    %11 = vector.load %arg6[%c0_10, %c0_11] : memref<32x128xf32, #tpu.memory_space<vmem>>, vector<32x128xf32>
    %cst_12 = arith.constant dense<0.000000e+00> : vector<8x128xf32>
    %12 = tpu.matmul %10, %11, %cst_12 {dimension_numbers = #tpu.dot_dimension_numbers<[1], [0], [0], [1], [0, 0, 1, 1], [], []>, precision = #tpu.contract_precision<fp32>} : vector<8x32xf32>, vector<32x128xf32>, vector<8x128xf32> -> vector<8x128xf32>
    %c0_13 = arith.constant 0 : index
    %c0_14 = arith.constant 0 : index
    %13 = vector.load %arg7[%c0_13, %c0_14] : memref<1x128xf32, #tpu.memory_space<vmem>>, vector<1x128xf32>
    %14 = vector.broadcast %13 : vector<1x128xf32> to vector<8x128xf32>
    %15 = arith.addf %12, %14 : vector<8x128xf32>
    %cst_15 = arith.constant dense<0xFF800000> : vector<8xf32>
    %16 = vector.multi_reduction <maximumf>, %15, %cst_15 [1] : vector<8x128xf32> to vector<8xf32>
    %17 = vector.shape_cast %16 : vector<8xf32> to vector<8x1xf32>
    %18 = vector.broadcast %17 : vector<8x1xf32> to vector<8x128xf32>
    %19 = arith.subf %15, %18 : vector<8x128xf32>
    %20 = math.exp %19 : vector<8x128xf32>
    %cst_16 = arith.constant dense<0.000000e+00> : vector<8xf32>
    %21 = vector.multi_reduction <add>, %20, %cst_16 [1] : vector<8x128xf32> to vector<8xf32>
    %22 = vector.shape_cast %21 : vector<8xf32> to vector<8x1xf32>
    %23 = vector.broadcast %22 : vector<8x1xf32> to vector<8x128xf32>
    %24 = arith.divf %20, %23 : vector<8x128xf32>
    %c0_17 = arith.constant 0 : index
    %c0_18 = arith.constant 0 : index
    %25 = vector.load %arg8[%c0_17, %c0_18] : memref<8x128xf32, #tpu.memory_space<vmem>>, vector<8x128xf32>
    tpu.vector_store %arg8[%c0_17, %c0_18], %24 {strides = array<i32>} : memref<8x128xf32, #tpu.memory_space<vmem>>, vector<8x128xf32>,
    return
  }
  func.func @transform_0(%arg0: i32) -> (i32, i32) {
    %c0_i32 = arith.constant 0 : i32
    %c0_i32_0 = arith.constant 0 : i32
    return %arg0, %c0_i32 : i32, i32
  }
  func.func @transform_1(%arg0: i32) -> (i32, i32) {
    %c0_i32 = arith.constant 0 : i32
    %c0_i32_0 = arith.constant 0 : i32
    %c0_i32_1 = arith.constant 0 : i32
    return %c0_i32, %c0_i32_0 : i32, i32
  }
  func.func @transform_2(%arg0: i32) -> (i32, i32) {
    %c0_i32 = arith.constant 0 : i32
    %c0_i32_0 = arith.constant 0 : i32
    %c0_i32_1 = arith.constant 0 : i32
    return %c0_i32, %c0_i32_0 : i32, i32
  }
  func.func @transform_3(%arg0: i32) -> (i32, i32) {
    %c0_i32 = arith.constant 0 : i32
    %c0_i32_0 = arith.constant 0 : i32
    %c0_i32_1 = arith.constant 0 : i32
    return %c0_i32, %c0_i32_0 : i32, i32
  }
  func.func @transform_4(%arg0: i32) -> (i32, i32) {
    %c0_i32 = arith.constant 0 : i32
    %c0_i32_0 = arith.constant 0 : i32
    %c0_i32_1 = arith.constant 0 : i32
    return %c0_i32, %c0_i32_0 : i32, i32
  }
  func.func @transform_5(%arg0: i32) -> (i32, i32) {
    %c0_i32 = arith.constant 0 : i32
    %c0_i32_0 = arith.constant 0 : i32
    %c0_i32_1 = arith.constant 0 : i32
    return %c0_i32, %c0_i32_0 : i32, i32
  }
  func.func @transform_6(%arg0: i32) -> (i32, i32) {
    %c0_i32 = arith.constant 0 : i32
    %c0_i32_0 = arith.constant 0 : i32
    %c0_i32_1 = arith.constant 0 : i32
    return %c0_i32, %c0_i32_0 : i32, i32
  }
  func.func @transform_7(%arg0: i32) -> (i32, i32) {
    %c0_i32 = arith.constant 0 : i32
    %c0_i32_0 = arith.constant 0 : i32
    return %arg0, %c0_i32 : i32, i32
  }
}

</mosaic_0001>

<bundles_post_ra>
// kernel: mlp_forward.1
= control target key start
LH: loop header
LB: loop body
LE: loop exit
PB: predicated region body
PF: predicated region fallthrough
CT: control target
= control target key end

     0   :  { %12 = vsyncpa [#allocation3], 0  ;;  %s2382_s0 = inlined_call_operand.hbm [shape: f32[8,32], index: 0, kind: input, shape index: {}]   ;;  %s2383_s1 = inlined_call_operand.hbm [shape: f32[32,32], index: 1, kind: input, shape index: {}]   ;;  %s2384_s2 = inlined_call_operand.vmem [shape: f32[1,32], index: 2, kind: input, shape index: {}]   ;;  %s2385_s3 = inlined_call_operand.hbm [shape: f32[32,32], index: 3, kind: input, shape index: {}]   ;;  %s2386_s4 = inlined_call_operand.vmem [shape: f32[1,32], index: 4, kind: input, shape index: {}]   ;;  %s2387_s5 = inlined_call_operand.hbm [shape: f32[32,128], index: 5, kind: input, shape index: {}]   ;;  %s2388_s6 = inlined_call_operand.vmem [shape: f32[1,128], index: 6, kind: input, shape index: {}]   ;;  %s2389_s7 = inlined_call_operand.hbm [shape: f32[8,128], index: 7, kind: output, shape index: {}]  }
   0x1   :  { %13 = vsyncpa [#allocation6], 0 }
   0x2   :  { %14 = vsyncpa [#allocation9], 0 }
   0x3   :  { %15 = vsyncpa [#allocation4], 0  ;;  %s2169_s24 = smov [#allocation5]   ;;  %s2051_s28 = scalar_lea.hbm %s2383_s1, 512 }
   0x4   :  { %s31_s25 = sshll.u32 %s2169_s24, 4  ;;  %p2052_p0 = scmp.ne.s32.totalorder %s2383_s1, %s2051_s28  ;;  %s32_s25 = int_to_ptr.vmem [resolvable:$true] %s31_s25 }
   0x5   :  { %p2055_p1 = scmp.lt.u32.totalorder %s2051_s28, %s2383_s1 }
   0x7   :  { %p2057_p2 = pnand %p2055_p1, %p2052_p0 }
   0x9   :  { %2060 = shalt.err (!%p2057_p2)
}
   0xa   :  { %s2061_s10 = scalar_lea.vmem %s32_s25, 512  ;;  %p2066_p4 = scmp.lt.s32.totalorder %s32_s25, %s32_s25 }
   0xb   :  { %p2062_p3 = scmp.ne.s32.totalorder %s32_s25, %s2061_s10  ;;  %p2067_p5 = scmp.lt.s32.totalorder %s2061_s10, %s2061_s10 }
   0xd   :  { %p2068_p6 = por %p2067_p5, %p2066_p4 }
   0xf   :  { %p2069_p7 = pnand %p2068_p6, %p2062_p3 }
  0x11   :  { %2072 = shalt.err (!%p2069_p7)
}
  0x12   :  { %s2170_s11 = smov 128   ;;  %s2171_s12 = smov 8  }
  0x13   :  { %37 = dma.hbm_to_vmem [thread:$0]  %s2383_s1, 512, %s32_s25, [#allocation6], %s2170_s11, %s2170_s11, %s2171_s12  }
  0x14   :  { %s2172_s15 = smov [#allocation2]   ;;  %s2173_s17 = smov [#allocation7]  }
  0x15   :  { %s22_s16 = sshll.u32 %s2172_s15, 4  ;;  %s45_s18 = sshll.u32 %s2173_s17, 4  ;;  %s23_s16 = int_to_ptr.vmem [resolvable:$true] %s22_s16  ;;  %s46_s18 = int_to_ptr.vmem [resolvable:$true] %s45_s18 }
  0x16   :  { %s2073_s21 = scalar_lea.hbm %s2382_s0, 128 }
  0x17   :  { %p2074_p8 = scmp.ne.s32.totalorder %s2382_s0, %s2073_s21  ;;  %p2077_p9 = scmp.lt.u32.totalorder %s2073_s21, %s2382_s0 }
  0x19   :  { %p2079_p10 = pnand %p2077_p9, %p2074_p8 }
  0x1b   :  { %2082 = shalt.err (!%p2079_p10)
}
  0x1c   :  { %s2083_s1 = scalar_lea.vmem %s23_s16, 128  ;;  %p2088_p12 = scmp.lt.s32.totalorder %s23_s16, %s23_s16 }
  0x1d   :  { %p2084_p11 = scmp.ne.s32.totalorder %s23_s16, %s2083_s1  ;;  %p2089_p13 = scmp.lt.s32.totalorder %s2083_s1, %s2083_s1 }
  0x1f   :  { %p2090_p0 = por %p2089_p13, %p2088_p12 }
  0x21   :  { %p2091_p1 = pnand %p2090_p0, %p2084_p11 }
  0x23   :  { %2094 = shalt.err (!%p2091_p1)
}
  0x24   :  { %25 = dma.hbm_to_vmem [thread:$0]  %s2382_s0, 128, %s23_s16, [#allocation3]  }
  0x25   :  { %s2095_s30 = scalar_lea.hbm %s2385_s3, 512 }
  0x26   :  { %p2096_p2 = scmp.ne.s32.totalorder %s2385_s3, %s2095_s30  ;;  %p2099_p3 = scmp.lt.u32.totalorder %s2095_s30, %s2385_s3 }
  0x28   :  { %p2101_p4 = pnand %p2099_p3, %p2096_p2 }
  0x2a   :  { %2104 = shalt.err (!%p2101_p4)
}
  0x2b   :  { %s2105_s14 = scalar_lea.vmem %s46_s18, 512  ;;  %p2110_p6 = scmp.lt.s32.totalorder %s46_s18, %s46_s18 }
  0x2c   :  { %p2106_p5 = scmp.ne.s32.totalorder %s46_s18, %s2105_s14  ;;  %p2111_p7 = scmp.lt.s32.totalorder %s2105_s14, %s2105_s14 }
  0x2e   :  { %p2112_p8 = por %p2111_p7, %p2110_p6 }
  0x30   :  { %p2113_p9 = pnand %p2112_p8, %p2106_p5 }
  0x32   :  { %2116 = shalt.err (!%p2113_p9)
}
  0x33   :  { %51 = dma.hbm_to_vmem [thread:$0]  %s2385_s3, 512, %s46_s18, [#allocation6], %s2170_s11, %s2170_s11, %s2171_s12  }
  0x34   :  { %s2174_s16 = smov [#allocation8]   ;;  %s2117_s21 = scalar_lea.hbm %s2387_s5, 512 }
  0x35   :  { %s59_s17 = sshll.u32 %s2174_s16, 4  ;;  %p2118_p10 = scmp.ne.s32.totalorder %s2387_s5, %s2117_s21  ;;  %s60_s17 = int_to_ptr.vmem [resolvable:$true] %s59_s17 }
  0x36   :  { %p2121_p11 = scmp.lt.u32.totalorder %s2117_s21, %s2387_s5 }
  0x38   :  { %p2123_p12 = pnand %p2121_p11, %p2118_p10 }
  0x3a   :  { %2126 = shalt.err (!%p2123_p12)
}
  0x3b   :  { %s2127_s1 = scalar_lea.vmem %s60_s17, 512  ;;  %p2132_p0 = scmp.lt.s32.totalorder %s60_s17, %s60_s17 }
  0x3c   :  { %p2128_p13 = scmp.ne.s32.totalorder %s60_s17, %s2127_s1  ;;  %p2133_p1 = scmp.lt.s32.totalorder %s2127_s1, %s2127_s1 }
  0x3e   :  { %p2134_p2 = por %p2133_p1, %p2132_p0 }
  0x40   :  { %p2135_p3 = pnand %p2134_p2, %p2128_p13 }
  0x42   :  { %2138 = shalt.err (!%p2135_p3)
}
  0x43   :  { %65 = dma.hbm_to_vmem [thread:$0]  %s2387_s5, 512, %s60_s17, [#allocation9], %s2170_s11, %s2170_s11, %s2171_s12  }
  0x44   :  { %2161 = dma.done.wait [#allocation3], 128  }
  0x45   :  { %2162 = vsyncadd [#allocation3], 4294967168 }
  0x46   :  { %2163 = dma.done.wait [#allocation6], 1024  }
  0x47   :  { %2164 = vsyncadd [#allocation6], 4294966272 }
  0x48   :  { %2165 = dma.done.wait [#allocation9], 512  }
  0x49   :  { %2166 = vsyncadd [#allocation9], 4294966784  ;;  %v2175_v0 = vmov 0.0|0.0   ;;  %vm2176_vm0 = vmmov 0   ;;  %v2177_v1 = vmov 0.0   ;;  %vm92_vm1 = vcmask 261120  }
  0x4a   :  { %1897 = vmatprep.subr.bf16.mxu1 %v2175_v0  ;;  %1915 = vmatprep.subr.bf16.mxu0 %v2175_v0  ;;  %v81_v2 = vld [vmem:[#allocation5] sm:$0xff]  ;;  %v82_v3 = vld [vmem:[#allocation5 + $0x8] sm:$0xff]  ;;  %v83_v4 = vld [vmem:[#allocation5 + $0x10] sm:$0xff]  ;;  %s2178_s27 = smov [#allocation10]  }
  0x4b   :  { %1707 = vmatprep.mubr.msk.f32.mxu1 %vm2176_vm0, %v2177_v1  ;;  %1740 = vmatprep.mubr.msk.f32.mxu0 %vm2176_vm0, %v2177_v1  ;;  %v97_v5 = vand.u32 4294901760, %v81_v2  ;;  %v100_v6 = vand.u32 4294901760, %v82_v3  ;;  %v84_v7 = vld [vmem:[#allocation5 + $0x18] sm:$0xff]  ;;  %v103_v8 = vand.u32 4294901760, %v83_v4  ;;  %v581_v41 = vld [vmem:[#allocation7] sm:$0xff]  ;;  %v582_v42 = vld [vmem:[#allocation7 + $0x8] sm:$0xff] }
  0x4c   :  { %v80_v9 = vld [vmem:[#allocation2] sm:$0xff]  ;;  %v106_v10 = vand.u32 4294901760, %v84_v7  ;;  %v596_v43 = vand.u32 4294901760, %v581_v41  ;;  %v599_v44 = vand.u32 4294901760, %v582_v42  ;;  %v583_v48 = vld [vmem:[#allocation7 + $0x10] sm:$0xff]  ;;  %s1595_s28 = sshll.u32 %s2178_s27, 4  ;;  %s1596_s28 = int_to_ptr.vmem [resolvable:$true] %s1595_s28 }
  0x4d   :  { %v94_v11 = vsel %vm92_vm1, %v80_v9, 0  ;;  %v1898_v12 = vpack.c.bf16 %v100_v6, %v97_v5  ;;  %v177_v13 = vsub.f32 %v81_v2, %v97_v5  ;;  %v184_v14 = vsub.f32 %v82_v3, %v100_v6  ;;  %v584_v49 = vld [vmem:[#allocation7 + $0x18] sm:$0xff]  ;;  %s2139_s29 = scalar_lea.vmem %s1596_s28, 128  ;;  %p2144_p5 = scmp.lt.s32.totalorder %s1596_s28, %s1596_s28 }
  0x4e   :  { %v191_v15 = vsub.f32 %v83_v4, %v103_v8  ;;  %v198_v16 = vsub.f32 %v84_v7, %v106_v10  ;;  %v165_v17 = vand.u32 4294901760, %v94_v11  ;;  %v1901_v18 = vpack.c.bf16 %v106_v10, %v103_v8  ;;  %p2140_p4 = scmp.ne.s32.totalorder %s1596_s28, %s2139_s29  ;;  %p2145_p6 = scmp.lt.s32.totalorder %s2139_s29, %s2139_s29 }
  0x4f   :  { %1899 = vmatpush3.bf16.msra.mxu1 %v1898_v12  ;;  %1917 = vmatpush3.bf16.msra.mxu0 %v1898_v12  ;;  %v178_v19 = vand.u32 4294901760, %v177_v13  ;;  %v185_v20 = vand.u32 4294901760, %v184_v14  ;;  %v1910_v39 = vpack.c.bf16 %v184_v14, %v177_v13  ;;  %v2307_v45 = vpack.c.bf16 %v599_v44, %v596_v43 }
  0x50   :  { %v192_v21 = vand.u32 4294901760, %v191_v15  ;;  %1900 = vmatprep.subr.bf16.mxu1 %v2175_v0  ;;  %1918 = vmatprep.subr.bf16.mxu0 %v2175_v0  ;;  %v166_v22 = vsub.f32 %v94_v11, %v165_v17  ;;  %v199_v23 = vand.u32 4294901760, %v198_v16  ;;  %v1913_v40 = vpack.c.bf16 %v198_v16, %v191_v15  ;;  %v1606_v11 = vld [vmem:[%s2384_s2] ss:$0 sm:$0xff]  ;;  %p2146_p7 = por %p2145_p6, %p2144_p5 }
  0x51   :  { %v179_v24 = vsub.f32 %v177_v13, %v178_v19  ;;  %v186_v25 = vsub.f32 %v184_v14, %v185_v20  ;;  %v1922_v31 = vpack.c.bf16 %v185_v20, %v178_v19  ;;  %v676_v46 = vsub.f32 %v581_v41, %v596_v43 }
  0x52   :  { %v193_v26 = vsub.f32 %v191_v15, %v192_v21  ;;  %v167_v27 = vand.u32 4294901760, %v166_v22  ;;  %v200_v28 = vsub.f32 %v198_v16, %v199_v23  ;;  %v1925_v37 = vpack.c.bf16 %v199_v23, %v192_v21  ;;  %p2147_p8 = pnand %p2146_p7, %p2140_p4 }
  0x53   :  { %1902 = vmatpush3.bf16.msra.mxu1 %v1901_v18  ;;  %1920 = vmatpush3.bf16.msra.mxu0 %v1901_v18  ;;  %v180_v29 = vand.u32 4294901760, %v179_v24  ;;  %v187_v30 = vand.u32 4294901760, %v186_v25  ;;  %v683_v47 = vsub.f32 %v582_v42, %v599_v44  ;;  %v602_v50 = vand.u32 4294901760, %v583_v48  ;;  %v1080_v24 = vld [vmem:[#allocation8] sm:$0xff]  ;;  %v1081_v25 = vld [vmem:[#allocation8 + $0x8] sm:$0xff] }
  0x54   :  { %v168_v32 = vsub.f32 %v166_v22, %v167_v27  ;;  %1903 = vmatprep.subr.bf16.mxu1 %v2175_v0  ;;  %1921 = vmatprep.subr.bf16.mxu0 %v2175_v0  ;;  %v194_v34 = vand.u32 4294901760, %v193_v26  ;;  %v201_v35 = vand.u32 4294901760, %v200_v28  ;;  %v605_v51 = vand.u32 4294901760, %v584_v49 }
  0x55   :  { %v1904_v33 = vpack.c.bf16 %v187_v30, %v180_v29  ;;  %v677_v52 = vand.u32 4294901760, %v676_v46  ;;  %v684_v53 = vand.u32 4294901760, %v683_v47  ;;  %v690_v55 = vsub.f32 %v583_v48, %v602_v50 }
  0x56   :  { %v169_v36 = vand.u32 4294901760, %v168_v32  ;;  %1741 = vmatmul.mubr.f32.vlgmr.msra.gmra.mrb[0].mxu0 %v167_v27  ;;  %v1907_v38 = vpack.c.bf16 %v201_v35, %v194_v34  ;;  %v1937_v54 = vpack.c.bf16 %v605_v51, %v602_v50  ;;  %v697_v56 = vsub.f32 %v584_v49, %v605_v51  ;;  %v1083_v32 = vld [vmem:[#allocation8 + $0x18] sm:$0xff] }
  0x57   :  { %1923 = vmatpush3.bf16.msra.mxu0 %v1922_v31  ;;  %1751 = vmatprep.mubr.msk.f32.mxu0 %vm2176_vm0, %v2177_v1  ;;  %v678_v57 = vsub.f32 %v676_v46, %v677_v52  ;;  %v685_v58 = vsub.f32 %v683_v47, %v684_v53  ;;  %v691_v60 = vand.u32 4294901760, %v690_v55  ;;  %v1946_v7 = vpack.c.bf16 %v683_v47, %v676_v46  ;;  %v1082_v31 = vld [vmem:[#allocation8 + $0x10] sm:$0xff] }
  0x58   :  { %1708 = vmatmul.mubr.f32.vlgmr.msra.gmra.mrb[0].mxu1 %v169_v36  ;;  %1924 = vmatprep.subr.bf16.mxu0 %v2175_v0  ;;  %v698_v61 = vand.u32 4294901760, %v697_v56  ;;  %v1949_v8 = vpack.c.bf16 %v697_v56, %v690_v55  ;;  %v1958_v9 = vpack.c.bf16 %v684_v53, %v677_v52  ;;  %v1095_v26 = vand.u32 4294901760, %v1080_v24 }
  0x59   :  { %1905 = vmatpush3.bf16.msra.mxu1 %v1904_v33  ;;  %1718 = vmatprep.mubr.msk.f32.mxu1 %vm2176_vm0, %v2177_v1  ;;  %v679_v59 = vand.u32 4294901760, %v678_v57  ;;  %v686_v62 = vand.u32 4294901760, %v685_v58  ;;  %v692_v63 = vsub.f32 %v690_v55, %v691_v60  ;;  %v1098_v27 = vand.u32 4294901760, %v1081_v25 }
  0x5a   :  { %1906 = vmatprep.subr.bf16.mxu1 %v2175_v0  ;;  %v699_v2 = vsub.f32 %v697_v56, %v698_v61  ;;  %v1961_v10 = vpack.c.bf16 %v698_v61, %v691_v60  ;;  %v1175_v29 = vsub.f32 %v1080_v24, %v1095_v26  ;;  %v1101_v33 = vand.u32 4294901760, %v1082_v31  ;;  %v1607_v56 = vld [vmem:[%s2386_s4] ss:$0 sm:$0xff] }
  0x5b   :  { %1926 = vmatpush3.bf16.msra.mxu0 %v1925_v37  ;;  %v1940_v3 = vpack.c.bf16 %v686_v62, %v679_v59  ;;  %v693_v4 = vand.u32 4294901760, %v692_v63  ;;  %v2337_v28 = vpack.c.bf16 %v1098_v27, %v1095_v26  ;;  %v1182_v30 = vsub.f32 %v1081_v25, %v1098_v27 }
  0x5c   :  { %1927 = vmatprep.subr.bf16.mxu0 %v2175_v0  ;;  %v700_v5 = vand.u32 4294901760, %v699_v2  ;;  %v1104_v34 = vand.u32 4294901760, %v1083_v32  ;;  %v1176_v35 = vand.u32 4294901760, %v1175_v29 }
  0x5d   :  { %1908 = vmatpush3.bf16.msra.mxu1 %v1907_v38  ;;  %v1183_v36 = vand.u32 4294901760, %v1182_v30  ;;  %v1189_v38 = vsub.f32 %v1082_v31, %v1101_v33  ;;  %v1982_v52 = vpack.c.bf16 %v1182_v30, %v1175_v29 }
  0x5e   :  { %1909 = vmatprep.subr.bf16.mxu1 %v2175_v0  ;;  %1752 = vmatmul.mubr.f32.vlgmr.msra.gmra.mrb[0].mxu0 %v165_v17  ;;  %v1943_v6 = vpack.c.bf16 %v700_v5, %v693_v4  ;;  %v1973_v37 = vpack.c.bf16 %v1104_v34, %v1101_v33  ;;  %v1608_v4 = vld [vmem:[%s2388_s6] ss:$0 sm:$0xff] }
  0x5f   :  { %1929 = vmatpush3.bf16.msra.mxu0 %v1898_v12  ;;  %1762 = vmatprep.mubr.msk.f32.mxu0 %vm2176_vm0, %v2177_v1  ;;  %v1184_v41 = vsub.f32 %v1182_v30, %v1183_v36  ;;  %v1190_v43 = vand.u32 4294901760, %v1189_v38 }
  0x60   :  { %1719 = vmatmul.mubr.f32.vlgmr.msra.gmra.mrb[0].mxu1 %v165_v17  ;;  %1930 = vmatprep.subr.bf16.mxu0 %v2175_v0 }
  0x61   :  { %1911 = vmatpush3.bf16.msra.mxu1 %v1910_v39  ;;  %1729 = vmatprep.mubr.msk.f32.mxu1 %vm2176_vm0, %v2177_v1  ;;  %v1196_v39 = vsub.f32 %v1083_v32, %v1104_v34  ;;  %v1191_v46 = vsub.f32 %v1189_v38, %v1190_v43 }
  0x62   :  { %1912 = vmatprep.subr.bf16.mxu1 %v2175_v0 }
  0x63   :  { %1932 = vmatpush3.bf16.msra.mxu0 %v1901_v18  ;;  %v1197_v44 = vand.u32 4294901760, %v1196_v39  ;;  %v1192_v49 = vand.u32 4294901760, %v1191_v46  ;;  %v1985_v53 = vpack.c.bf16 %v1196_v39, %v1189_v38 }
  0x64   :  { %1969 = vmatprep.subr.bf16.mxu0 %v2175_v0 }
  0x65   :  { %1914 = vmatpush3.bf16.msra.mxu1 %v1913_v40  ;;  %v1177_v40 = vsub.f32 %v1175_v29, %v1176_v35  ;;  %v1198_v47 = vsub.f32 %v1196_v39, %v1197_v44  ;;  %v1997_v55 = vpack.c.bf16 %v1197_v44, %v1190_v43 }
  0x66   :  { %1763 = vmatmul.mubr.f32.vlgmr.msra.gmra.mrb[0].mxu0 %v165_v17  ;;  %1933 = vmatprep.subr.bf16.mxu1 %v2175_v0 }
  0x67   :  { %1839 = vmatprep.mubr.msk.f32.mxu0 %vm2176_vm0, %v2177_v1  ;;  %1971 = vmatpush3.bf16.msra.mxu0 %v2337_v28  ;;  %v1178_v42 = vand.u32 4294901760, %v1177_v40  ;;  %v1199_v50 = vand.u32 4294901760, %v1198_v47 }
  0x68   :  { %1730 = vmatmul.mubr.f32.vlgmr.msra.gmra.mrb[0].mxu1 %v166_v22  ;;  %1972 = vmatprep.subr.bf16.mxu0 %v2175_v0 }
  0x69   :  { %1773 = vmatprep.mubr.msk.f32.mxu1 %vm2176_vm0, %v2177_v1  ;;  %1935 = vmatpush3.bf16.msra.mxu1 %v2307_v45  ;;  %v1979_v51 = vpack.c.bf16 %v1199_v50, %v1192_v49 }
  0x6a   :  { %1936 = vmatprep.subr.bf16.mxu1 %v2175_v0 }
  0x6b   :  { %1974 = vmatpush3.bf16.msra.mxu0 %v1973_v37 }
  0x6c   :  { %1975 = vmatprep.subr.bf16.mxu0 %v2175_v0 }
  0x6d   :  { %1938 = vmatpush3.bf16.msra.mxu1 %v1937_v54 }
  0x6e   :  { %1939 = vmatprep.subr.bf16.mxu1 %v2175_v0 }
 0x139   :  { %v577_v12 = vpop.f32.mrb[0].mxu0 }
 0x13a   :  { %v1764_v13 = vpop.f32.mrb[1].mxu0 }
 0x13b   :  { %v342_v14 = vpop.f32.mrb[0].mxu1 }
 0x13c   :  { %v2005_v15 = vadd.f32 %v1606_v11, %v342_v14  ;;  %v1731_v16 = vpop.f32.mrb[1].mxu1 }
 0x13e   :  { %v2006_v17 = vadd.f32 %v2005_v15, %v577_v12 }
 0x140   :  { %v593_v18 = vsel %vm92_vm1, %v2006_v17, 0 }
 0x141   :  { %v664_v19 = vand.u32 4294901760, %v593_v18 }
 0x143   :  { %v665_v20 = vsub.f32 %v593_v18, %v664_v19 }
 0x145   :  { %v666_v21 = vand.u32 4294901760, %v665_v20 }
 0x147   :  { %v667_v22 = vsub.f32 %v665_v20, %v666_v21 }
 0x149   :  { %v668_v23 = vand.u32 4294901760, %v667_v22 }
 0x14b   :  { %1774 = vmatmul.mubr.f32.vlgmr.msra.gmra.mrb[2].mxu1 %v668_v23 }
 0x14c   :  { %1941 = vmatpush3.bf16.msra.mxu1 %v1940_v3  ;;  %1784 = vmatprep.mubr.msk.f32.mxu1 %vm2176_vm0, %v2177_v1 }
 0x14d   :  { %1942 = vmatprep.subr.bf16.mxu1 %v2175_v0 }
 0x150   :  { %1944 = vmatpush3.bf16.msra.mxu1 %v1943_v6 }
 0x151   :  { %1945 = vmatprep.subr.bf16.mxu1 %v2175_v0 }
 0x153   :  { %1785 = vmatmul.mubr.f32.vlgmr.msra.gmra.mrb[2].mxu1 %v664_v19 }
 0x154   :  { %1947 = vmatpush3.bf16.msra.mxu1 %v1946_v7  ;;  %1795 = vmatprep.mubr.msk.f32.mxu1 %vm2176_vm0, %v2177_v1 }
 0x155   :  { %1948 = vmatprep.subr.bf16.mxu1 %v2175_v0 }
 0x158   :  { %1950 = vmatpush3.bf16.msra.mxu1 %v1949_v8 }
 0x159   :  { %1951 = vmatprep.subr.bf16.mxu1 %v2175_v0 }
 0x15b   :  { %1796 = vmatmul.mubr.f32.vlgmr.msra.gmra.mrb[2].mxu1 %v665_v20 }
 0x15c   :  { %1953 = vmatpush3.bf16.msra.mxu1 %v2307_v45  ;;  %1806 = vmatprep.mubr.msk.f32.mxu1 %vm2176_vm0, %v2177_v1 }
 0x15d   :  { %1954 = vmatprep.subr.bf16.mxu1 %v2175_v0 }
 0x160   :  { %1956 = vmatpush3.bf16.msra.mxu1 %v1937_v54 }
 0x161   :  { %1957 = vmatprep.subr.bf16.mxu1 %v2175_v0 }
 0x163   :  { %1807 = vmatmul.mubr.f32.vlgmr.msra.gmra.mrb[2].mxu1 %v666_v21 }
 0x164   :  { %1959 = vmatpush3.bf16.msra.mxu1 %v1958_v9  ;;  %1817 = vmatprep.mubr.msk.f32.mxu1 %vm2176_vm0, %v2177_v1 }
 0x165   :  { %1960 = vmatprep.subr.bf16.mxu1 %v2175_v0 }
 0x168   :  { %1962 = vmatpush3.bf16.msra.mxu1 %v1961_v10 }
 0x169   :  { %1963 = vmatprep.subr.bf16.mxu1 %v2175_v0 }
 0x16b   :  { %1818 = vmatmul.mubr.f32.vlgmr.msra.gmra.mrb[2].mxu1 %v664_v19 }
 0x16c   :  { %1965 = vmatpush3.bf16.msra.mxu1 %v2307_v45  ;;  %1828 = vmatprep.mubr.msk.f32.mxu1 %vm2176_vm0, %v2177_v1  ;;  %v1185_v45 = vand.u32 4294901760, %v1184_v41 }
 0x16d   :  { %1966 = vmatprep.subr.bf16.mxu1 %v2175_v0 }
 0x16e   :  { %v1976_v48 = vpack.c.bf16 %v1185_v45, %v1178_v42 }
 0x170   :  { %1968 = vmatpush3.bf16.msra.mxu1 %v1937_v54  ;;  %v1994_v54 = vpack.c.bf16 %v1183_v36, %v1176_v35 }
 0x173   :  { %1829 = vmatmul.mubr.f32.vlgmr.msra.gmra.mrb[2].mxu1 %v664_v19 }
 0x246   :  { %v1076_v57 = vpop.f32.mrb[2].mxu1 }
 0x247   :  { %v2007_v58 = vadd.f32 %v1607_v56, %v1076_v57  ;;  %v1830_v59 = vpop.f32.mrb[3].mxu1 }
 0x249   :  { %v1092_v60 = vsel %vm92_vm1, %v2007_v58, 0 }
 0x24a   :  { %v1163_v61 = vand.u32 4294901760, %v1092_v60 }
 0x24c   :  { %v1164_v62 = vsub.f32 %v1092_v60, %v1163_v61 }
 0x24e   :  { %v1165_v63 = vand.u32 4294901760, %v1164_v62 }
 0x250   :  { %v1166_v2 = vsub.f32 %v1164_v62, %v1165_v63 }
 0x252   :  { %v1167_v3 = vand.u32 4294901760, %v1166_v2 }
 0x254   :  { %1840 = vmatmul.mubr.f32.vlgmr.msra.gmra.mrb[2].mxu0 %v1167_v3 }
 0x255   :  { %1977 = vmatpush3.bf16.msra.mxu0 %v1976_v48  ;;  %1850 = vmatprep.mubr.msk.f32.mxu0 %vm2176_vm0, %v2177_v1 }
 0x256   :  { %1978 = vmatprep.subr.bf16.mxu0 %v2175_v0 }
 0x259   :  { %1980 = vmatpush3.bf16.msra.mxu0 %v1979_v51 }
 0x25a   :  { %1981 = vmatprep.subr.bf16.mxu0 %v2175_v0 }
 0x25c   :  { %1851 = vmatmul.mubr.f32.vlgmr.msra.gmra.mrb[2].mxu0 %v1163_v61 }
 0x25d   :  { %1983 = vmatpush3.bf16.msra.mxu0 %v1982_v52  ;;  %1861 = vmatprep.mubr.msk.f32.mxu0 %vm2176_vm0, %v2177_v1 }
 0x25e   :  { %1984 = vmatprep.subr.bf16.mxu0 %v2175_v0 }
 0x261   :  { %1986 = vmatpush3.bf16.msra.mxu0 %v1985_v53 }
 0x262   :  { %1987 = vmatprep.subr.bf16.mxu0 %v2175_v0 }
 0x264   :  { %1862 = vmatmul.mubr.f32.vlgmr.msra.gmra.mrb[2].mxu0 %v1164_v62 }
 0x265   :  { %1989 = vmatpush3.bf16.msra.mxu0 %v2337_v28  ;;  %1872 = vmatprep.mubr.msk.f32.mxu0 %vm2176_vm0, %v2177_v1 }
 0x266   :  { %1990 = vmatprep.subr.bf16.mxu0 %v2175_v0 }
 0x269   :  { %1992 = vmatpush3.bf16.msra.mxu0 %v1973_v37 }
 0x26a   :  { %1993 = vmatprep.subr.bf16.mxu0 %v2175_v0 }
 0x26c   :  { %1873 = vmatmul.mubr.f32.vlgmr.msra.gmra.mrb[2].mxu0 %v1165_v63 }
 0x26d   :  { %1995 = vmatpush3.bf16.msra.mxu0 %v1994_v54  ;;  %1883 = vmatprep.mubr.msk.f32.mxu0 %vm2176_vm0, %v2177_v1 }
 0x26e   :  { %1996 = vmatprep.subr.bf16.mxu0 %v2175_v0 }
 0x271   :  { %1998 = vmatpush3.bf16.msra.mxu0 %v1997_v55 }
 0x272   :  { %1999 = vmatprep.subr.bf16.mxu0 %v2175_v0 }
 0x274   :  { %1884 = vmatmul.mubr.f32.vlgmr.msra.gmra.mrb[2].mxu0 %v1163_v61 }
 0x275   :  { %2001 = vmatpush3.bf16.msra.mxu0 %v2337_v28  ;;  %1894 = vmatprep.mubr.msk.f32.mxu0 %vm2176_vm0, %v2177_v1 }
 0x276   :  { %2002 = vmatprep.subr.bf16.mxu0 %v2175_v0 }
 0x279   :  { %2004 = vmatpush3.bf16.msra.mxu0 %v1973_v37 }
 0x27c   :  { %1895 = vmatmul.mubr.f32.vlgmr.msra.gmra.mrb[2].mxu0 %v1163_v61 }
 0x34f   :  { %v1575_v5 = vpop.f32.mrb[2].mxu0 }
 0x350   :  { %v2008_v6 = vadd.f32 %v1608_v4, %v1575_v5  ;;  %v1896_v7 = vpop.f32.mrb[3].mxu0 }
 0x352   :  { %1579 = vmax.xlane.f32.xlu0 %v2008_v6 }
 0x3df   :  { %v1580_v8 = vpop.xlane.xlu0 %1579 }
 0x3e0   :  { %v1581_v9 = vsub.f32 %v2008_v6, %v1580_v8 }
 0x3e2   :  { %v1582_v10 = vmul.f32 1.442695, %v1581_v9 }
 0x3e4   :  { %2047 = vpow2.f32 %v1582_v10 }
 0x3ee   :  { %v2048_v11 = vpop.eup %2047 }
 0x3ef   :  { %1584 = vadd.xlane.f32.xlu0 %v2048_v11 }
 0x47c   :  { %v1585_v12 = vpop.xlane.xlu0 %1584 }
 0x47d   :  { %2049 = vrcp.f32 %v1585_v12 }
 0x487   :  { %v2050_v0 = vpop.eup %2049 }
 0x488   :  { %v1587_v1 = vmul.f32 %v2050_v0, %v2048_v11 }
 0x48a   :  { %1588 = vst [vmem:[#allocation10] sm:$0xff] %v1587_v1 }
 0x48b   :  { %2150 = shalt.err (!%p2147_p8)
}
 0x48c   :  { %s2151_s8 = scalar_lea.hbm %s2389_s7, 128 }
 0x48d   :  { %p2152_p9 = scmp.ne.s32.totalorder %s2389_s7, %s2151_s8  ;;  %p2155_p10 = scmp.lt.u32.totalorder %s2151_s8, %s2389_s7 }
 0x48f   :  { %p2157_p11 = pnand %p2155_p10, %p2152_p9 }
 0x491   :  { %2160 = shalt.err (!%p2157_p11)
}
 0x492   :  { %1598 = dma.vmem_to_hbm [thread:$0]  %s1596_s28, 128, %s2389_s7, [#allocation4]  }
 0x493   :  { %2167 = dma.done.wait [#allocation4], 128  }
 0x494   :  { %2168 = vsyncadd [#allocation4], 4294967168 }
 0x495   :  { %1602 = vsyncpa [#allocation3], 1 }
 0x496   :  { %1603 = vsyncpa [#allocation6], 1 }
 0x497   :  { %1604 = vsyncpa [#allocation9], 1 }
 0x498   :  { %1605 = vsyncpa [#allocation4], 1 }

</bundles_post_ra>
